<compile_context>
chip_gen: v7x
topology: tpu7x:2x2x1
jax: 0.10.0
libtpu: 0.0.40
codegen_flags: <defaults>
</compile_context>

<pallas_src>
import functools

import jax
import jax.numpy as jnp
from jax import lax
from jax.experimental import pallas as pl
from jax.experimental.pallas import tpu as pltpu


def _mlp_kernel(x_ref, *refs, compute_dtype):
    """Fused mNet forward for one batch tile.

    x_ref  : (tb, input_dim)  natural-layout input block (caller's dtype)
    refs   : (W0, b0, W1, b1, ..., W_{L-1}, b_{L-1}, out_ref)
             W_l : (out_l, in_l) in compute_dtype (PyTorch layout)
             b_l : (out_l, 1)    in float32
    out_ref: (1, tb)            lane-dense final output block (float32)

    Activations are feature-major (features, tb): batch sits on the 128-wide
    lane axis, so the final (1, tb) store is unmasked and intermediates use few
    vregs.  The first layer contracts both operands on their feature axis
    (an "NT" matmul), so the (tb, input_dim) block never needs an explicit
    transpose.  All layers except the last are followed by ReLU.
    """
    out_ref = refs[-1]
    param_refs = refs[:-1]
    n_layers = len(param_refs) // 2

    x = x_ref[...].astype(compute_dtype)                       # (tb, in)
    w0 = param_refs[0][...]                                    # (width, in)
    b0 = param_refs[1][...]                                    # (width, 1) f32
    z = lax.dot_general(w0, x, (((1,), (1,)), ((), ())),       # W0 @ x^T
                        preferred_element_type=jnp.float32) + b0   # (width, tb)
    h = jnp.maximum(z, 0.0).astype(compute_dtype) if n_layers > 1 else z

    for layer in range(1, n_layers):
        w = param_refs[2 * layer][...]                         # (out, in)
        b = param_refs[2 * layer + 1][...]                     # (out, 1) f32
        z = jnp.dot(w, h, preferred_element_type=jnp.float32) + b   # (out, tb)
        if layer < n_layers - 1:
            h = jnp.maximum(z, 0.0).astype(compute_dtype)
        else:
            h = z
    # TODO(synk): if bundle profiles show MXU result-path stalls, compute the
    # final Linear(width, 1) as broadcast-multiply + sublane reduce (XLU) instead.
    out_ref[...] = h.astype(out_ref.dtype)                     # (1, tb), unmasked


def _default_compute_dtype():
    """bf16 operands on bf16-native VPUs (v5p/v6e/v7x); f32 on v5e and older."""
    try:
        kind = jax.devices()[0].device_kind.lower()
    except Exception:
        return jnp.float32
    for old in ("v2", "v3", "v4", "v5 lite", "v5lite", "v5e"):
        if old in kind:
            return jnp.float32
    return jnp.bfloat16


def mnet_forward(x, params, *, batch_tile=8192, compute_dtype=None):
    """Fused mNet forward pass as a single Pallas TPU kernel.

    x:       (B, input_dim) float array (kept in its natural layout; no wrapper
             transpose/cast — the kernel reads it directly from HBM blocks)
    params:  list of (W, b), W: (out_features, in_features) (PyTorch layout),
             b: (out_features,)
    returns: (B, 1) float32
    """
    B, input_dim = x.shape
    out_dim = params[-1][0].shape[0]   # == 1 for mNet
    if compute_dtype is None:
        compute_dtype = _default_compute_dtype()
    c_item = jnp.dtype(compute_dtype).itemsize

    # ---- batch-tile selection ----------------------------------------------
    # Big tiles amortize the ~0.35us per-grid-step overhead; keep lane alignment
    # (multiple of 128) and, once B is large enough to split, at least two grid
    # steps so the "parallel" batch axis feeds both v7x TensorCores.
    batch_tile = max(128, (int(batch_tile) // 128) * 128)
    if B < 256:
        tb = B                                            # single full-array tile
    else:
        half = -(-B // 2)                                 # cdiv(B, 2)
        tb = min(batch_tile, ((half + 127) // 128) * 128)  # lane-aligned, >=2 steps
    grid = (pl.cdiv(B, tb),)

    # ---- specs & args (x stays in HBM in its natural (B, input_dim) layout) --
    in_specs = [pl.BlockSpec((tb, input_dim), lambda i: (i, 0))]
    flat_args = [x]

    weight_bytes = sum(w.size * c_item + w.shape[0] * 4 for w, _ in params)
    # Constant-index blocks are fetched once; single-buffer them only when the
    # extra buffer would actually cost VMEM (large depth/width configs).
    single_buffer_weights = weight_bytes > (1 << 20)
    w_kwargs = {"pipeline_mode": pl.Buffered(1)} if single_buffer_weights else {}

    flops = 0
    bytes_accessed = x.size * x.dtype.itemsize
    for (w, b) in params:
        w_c = jnp.asarray(w, compute_dtype)                  # (out, in)
        b_c = jnp.asarray(b, jnp.float32).reshape(-1, 1)     # (out, 1)
        in_specs.append(pl.BlockSpec(w_c.shape, lambda i: (0, 0), **w_kwargs))
        in_specs.append(pl.BlockSpec(b_c.shape, lambda i: (0, 0), **w_kwargs))
        flat_args.extend([w_c, b_c])
        flops += 2 * B * w.shape[0] * w.shape[1]
        bytes_accessed += w_c.size * c_item + b_c.size * 4
    bytes_accessed += B * out_dim * 4

    out_spec = pl.BlockSpec((out_dim, tb), lambda i: (0, i))

    # ---- VMEM budget: explicit limit only when big tiles / big nets need it --
    max_width = max(w.shape[0] for w, _ in params)
    vmem_est = (2 * tb * input_dim * x.dtype.itemsize        # double-buffered input
                + 2 * tb * out_dim * 4                       # double-buffered output
                + (1 if single_buffer_weights else 2) * weight_bytes
                + 4 * max_width * tb * 4)                    # live f32 intermediates
    compiler_kwargs = {}
    if vmem_est > 12 * (1 << 20):
        compiler_kwargs["vmem_limit_bytes"] = int(
            min(60 * (1 << 20), max(32 * (1 << 20), 1.25 * vmem_est)))

    yT = pl.pallas_call(
        functools.partial(_mlp_kernel, compute_dtype=compute_dtype),
        out_shape=jax.ShapeDtypeStruct((out_dim, B), jnp.float32),
        grid=grid,
        in_specs=in_specs,
        out_specs=out_spec,
        compiler_params=pltpu.CompilerParams(
            dimension_semantics=("parallel",),   # batch tiles -> both v7x TCs
            **compiler_kwargs),
        cost_estimate=pl.CostEstimate(
            flops=flops, transcendentals=0, bytes_accessed=bytes_accessed),
    )(*flat_args)

    return yT.T   # (1, B) -> (B, 1): trivial reshape


def init_mnet_params(key, input_dim, node):
    """Deterministic init mirroring nn.Linear's default (uniform +-1/sqrt(fan_in)).

    Weights are stored in PyTorch-native (out_features, in_features) layout; the
    kernel computes W @ x^T (equivalent to PyTorch's x @ W.T + b).
    """
    depth, width = node
    dims = [input_dim] + [width] * depth + [1]
    params = []
    for fan_in, fan_out in zip(dims[:-1], dims[1:]):
        key, kw, kb = jax.random.split(key, 3)
        bound = 1.0 / (fan_in ** 0.5)
        w = jax.random.uniform(kw, (fan_out, fan_in), jnp.float32, -bound, bound)
        b = jax.random.uniform(kb, (fan_out,), jnp.float32, -bound, bound)
        params.append((w, b))
    return params


def mnet_reference(x, params):
    """Pure-JAX reference (float32) for correctness checking."""
    h = x
    for i, (w, b) in enumerate(params):
        h = h @ w.T + b
        if i < len(params) - 1:
            h = jnp.maximum(h, 0.0)
    return h


if __name__ == "__main__":
    # Shapes consistent with the module: input_dim=16, node=(depth=2, width=32)
    #   -> Linear(16,32)+ReLU, Linear(32,32)+ReLU, Linear(32,1)
    input_dim = 16
    node = (2, 32)
    batch = 8

    key = jax.random.PRNGKey(0)
    key, kx = jax.random.split(key)
    x = jax.random.normal(kx, (batch, input_dim), dtype=jnp.float32)
    params = init_mnet_params(key, input_dim, node)

    # 1) tiny batch, f32 operands, single grid step
    out = jax.block_until_ready(mnet_forward(x, params, compute_dtype=jnp.float32))
    ref = mnet_reference(x, params)
    assert out.shape == (batch, 1), out.shape
    assert jnp.allclose(out, ref, atol=1e-5, rtol=1e-5), (
        f"max abs err {jnp.max(jnp.abs(out - ref))}")

    # 2) ragged batch -> 2 grid steps + partial last tile, f32 operands
    xb = jax.random.normal(jax.random.PRNGKey(1), (1000, input_dim),
                           dtype=jnp.float32)
    ref_b = mnet_reference(xb, params)
    out_b = jax.block_until_ready(mnet_forward(xb, params,
                                               compute_dtype=jnp.float32))
    assert out_b.shape == (1000, 1), out_b.shape
    assert jnp.allclose(out_b, ref_b, atol=1e-4, rtol=1e-4), (
        f"max abs err {jnp.max(jnp.abs(out_b - ref_b))}")

    # 3) per-generation default operand dtype (bf16 on v6e/v7x/v5p, f32 on v5e);
    #    accumulation is always f32, tolerance loose only for the bf16 case.
    out_auto = jax.block_until_ready(mnet_forward(xb, params))
    assert jnp.allclose(out_auto, ref_b, atol=1e-1, rtol=1e-1), (
        f"max abs err {jnp.max(jnp.abs(out_auto - ref_b))}")

    # 4) explicit bf16 operands (the v6e/v7x MXU fast path)
    out_bf16 = jax.block_until_ready(
        mnet_forward(xb, params, compute_dtype=jnp.bfloat16))
    assert jnp.allclose(out_bf16, ref_b, atol=1e-1, rtol=1e-1), (
        f"max abs err {jnp.max(jnp.abs(out_bf16 - ref_b))}")

    print("KERNEL_OK")
</pallas_src>

<mosaic_0001>
module attributes {stable_mosaic.version = 11 : i64} {
  func.func @_mlp_kernel(%arg0: i32, %arg1: memref<8x16xf32, #tpu.memory_space<vmem>>, %arg2: memref<32x16xf32, #tpu.memory_space<vmem>>, %arg3: memref<32x1xf32, #tpu.memory_space<vmem>>, %arg4: memref<32x32xf32, #tpu.memory_space<vmem>>, %arg5: memref<32x1xf32, #tpu.memory_space<vmem>>, %arg6: memref<1x32xf32, #tpu.memory_space<vmem>>, %arg7: memref<1x1xf32, #tpu.memory_space<vmem>>, %arg8: memref<1x8xf32, #tpu.memory_space<vmem>>) attributes {dimension_semantics = [#tpu.dimension_semantics<parallel>], iteration_bounds = array<i64: 1>, scalar_prefetch = 0 : i64, scratch_operands = 0 : i64, tpu.core_type = #tpu.core_type<tc>, window_params = [{transform_indices = @transform_0, window_bounds = array<i64: 8, 16>}, {pipeline_mode = #tpu.pipeline_mode<synchronous>, transform_indices = @transform_1, window_bounds = array<i64: 32, 16>}, {pipeline_mode = #tpu.pipeline_mode<synchronous>, transform_indices = @transform_2, window_bounds = array<i64: 32, 1>}, {pipeline_mode = #tpu.pipeline_mode<synchronous>, transform_indices = @transform_3, window_bounds = array<i64: 32, 32>}, {pipeline_mode = #tpu.pipeline_mode<synchronous>, transform_indices = @transform_4, window_bounds = array<i64: 32, 1>}, {pipeline_mode = #tpu.pipeline_mode<synchronous>, transform_indices = @transform_5, window_bounds = array<i64: 1, 32>}, {pipeline_mode = #tpu.pipeline_mode<synchronous>, transform_indices = @transform_6, window_bounds = array<i64: 1, 1>}, {transform_indices = @transform_7, window_bounds = array<i64: 1, 8>}]} {
    %c0 = arith.constant 0 : index
    %c0_0 = arith.constant 0 : index
    %0 = vector.load %arg1[%c0, %c0_0] : memref<8x16xf32, #tpu.memory_space<vmem>>, vector<8x16xf32>
    %c0_1 = arith.constant 0 : index
    %c0_2 = arith.constant 0 : index
    %1 = vector.load %arg2[%c0_1, %c0_2] : memref<32x16xf32, #tpu.memory_space<vmem>>, vector<32x16xf32>
    %c0_3 = arith.constant 0 : index
    %c0_4 = arith.constant 0 : index
    %2 = vector.load %arg3[%c0_3, %c0_4] : memref<32x1xf32, #tpu.memory_space<vmem>>, vector<32x1xf32>
    %cst = arith.constant dense<0.000000e+00> : vector<32x8xf32>
    %3 = tpu.matmul %1, %0, %cst {dimension_numbers = #tpu.dot_dimension_numbers<[1], [1], [0], [0], [0, 0, 1, 0], [], []>} : vector<32x16xf32>, vector<8x16xf32>, vector<32x8xf32> -> vector<32x8xf32>
    %4 = vector.broadcast %2 : vector<32x1xf32> to vector<32x8xf32>
    %5 = arith.addf %3, %4 : vector<32x8xf32>
    %cst_5 = arith.constant 0.000000e+00 : f32
    %6 = vector.broadcast %cst_5 : f32 to vector<32x8xf32>
    %7 = arith.maximumf %5, %6 : vector<32x8xf32>
    %c0_6 = arith.constant 0 : index
    %c0_7 = arith.constant 0 : index
    %8 = vector.load %arg4[%c0_6, %c0_7] : memref<32x32xf32, #tpu.memory_space<vmem>>, vector<32x32xf32>
    %c0_8 = arith.constant 0 : index
    %c0_9 = arith.constant 0 : index
    %9 = vector.load %arg5[%c0_8, %c0_9] : memref<32x1xf32, #tpu.memory_space<vmem>>, vector<32x1xf32>
    %cst_10 = arith.constant dense<0.000000e+00> : vector<32x8xf32>
    %10 = tpu.matmul %8, %7, %cst_10 {dimension_numbers = #tpu.dot_dimension_numbers<[1], [0], [0], [1], [0, 0, 1, 1], [], []>} : vector<32x32xf32>, vector<32x8xf32>, vector<32x8xf32> -> vector<32x8xf32>
    %11 = vector.broadcast %9 : vector<32x1xf32> to vector<32x8xf32>
    %12 = arith.addf %10, %11 : vector<32x8xf32>
    %cst_11 = arith.constant 0.000000e+00 : f32
    %13 = vector.broadcast %cst_11 : f32 to vector<32x8xf32>
    %14 = arith.maximumf %12, %13 : vector<32x8xf32>
    %c0_12 = arith.constant 0 : index
    %c0_13 = arith.constant 0 : index
    %15 = vector.load %arg6[%c0_12, %c0_13] : memref<1x32xf32, #tpu.memory_space<vmem>>, vector<1x32xf32>
    %c0_14 = arith.constant 0 : index
    %c0_15 = arith.constant 0 : index
    %16 = vector.load %arg7[%c0_14, %c0_15] : memref<1x1xf32, #tpu.memory_space<vmem>>, vector<1x1xf32>
    %cst_16 = arith.constant dense<0.000000e+00> : vector<1x8xf32>
    %17 = tpu.matmul %15, %14, %cst_16 {dimension_numbers = #tpu.dot_dimension_numbers<[1], [0], [0], [1], [0, 0, 1, 1], [], []>} : vector<1x32xf32>, vector<32x8xf32>, vector<1x8xf32> -> vector<1x8xf32>
    %18 = vector.broadcast %16 : vector<1x1xf32> to vector<1x8xf32>
    %19 = arith.addf %17, %18 : vector<1x8xf32>
    %c0_17 = arith.constant 0 : index
    %c0_18 = arith.constant 0 : index
    %20 = vector.load %arg8[%c0_17, %c0_18] : memref<1x8xf32, #tpu.memory_space<vmem>>, vector<1x8xf32>
    tpu.vector_store %arg8[%c0_17, %c0_18], %19 {strides = array<i32>} : memref<1x8xf32, #tpu.memory_space<vmem>>, vector<1x8xf32>,
    return
  }
  func.func @transform_0(%arg0: i32) -> (i32, i32) {
    %c0_i32 = arith.constant 0 : i32
    %c0_i32_0 = arith.constant 0 : i32
    return %arg0, %c0_i32 : i32, i32
  }
  func.func @transform_1(%arg0: i32) -> (i32, i32) {
    %c0_i32 = arith.constant 0 : i32
    %c0_i32_0 = arith.constant 0 : i32
    %c0_i32_1 = arith.constant 0 : i32
    return %c0_i32, %c0_i32_0 : i32, i32
  }
  func.func @transform_2(%arg0: i32) -> (i32, i32) {
    %c0_i32 = arith.constant 0 : i32
    %c0_i32_0 = arith.constant 0 : i32
    %c0_i32_1 = arith.constant 0 : i32
    return %c0_i32, %c0_i32_0 : i32, i32
  }
  func.func @transform_3(%arg0: i32) -> (i32, i32) {
    %c0_i32 = arith.constant 0 : i32
    %c0_i32_0 = arith.constant 0 : i32
    %c0_i32_1 = arith.constant 0 : i32
    return %c0_i32, %c0_i32_0 : i32, i32
  }
  func.func @transform_4(%arg0: i32) -> (i32, i32) {
    %c0_i32 = arith.constant 0 : i32
    %c0_i32_0 = arith.constant 0 : i32
    %c0_i32_1 = arith.constant 0 : i32
    return %c0_i32, %c0_i32_0 : i32, i32
  }
  func.func @transform_5(%arg0: i32) -> (i32, i32) {
    %c0_i32 = arith.constant 0 : i32
    %c0_i32_0 = arith.constant 0 : i32
    %c0_i32_1 = arith.constant 0 : i32
    return %c0_i32, %c0_i32_0 : i32, i32
  }
  func.func @transform_6(%arg0: i32) -> (i32, i32) {
    %c0_i32 = arith.constant 0 : i32
    %c0_i32_0 = arith.constant 0 : i32
    %c0_i32_1 = arith.constant 0 : i32
    return %c0_i32, %c0_i32_0 : i32, i32
  }
  func.func @transform_7(%arg0: i32) -> (i32, i32) {
    %c0_i32 = arith.constant 0 : i32
    %c0_i32_0 = arith.constant 0 : i32
    return %c0_i32, %arg0 : i32, i32
  }
}

</mosaic_0001>

<bundles_post_ra>
// kernel: tpu_custom_call.1
= control target key start
LH: loop header
LB: loop body
LE: loop exit
PB: predicated region body
PF: predicated region fallthrough
CT: control target
= control target key end

     0   :  { %s624_s0 = inlined_call_operand.vmem [shape: f32[8,16], index: 0, kind: input, shape index: {}]   ;;  %s625_s1 = inlined_call_operand.vmem [shape: f32[32,16], index: 1, kind: input, shape index: {}]   ;;  %s626_s2 = inlined_call_operand.vmem [shape: f32[32,1], index: 2, kind: input, shape index: {}]   ;;  %s627_s3 = inlined_call_operand.vmem [shape: f32[32,32], index: 3, kind: input, shape index: {}]   ;;  %s628_s4 = inlined_call_operand.vmem [shape: f32[32,1], index: 4, kind: input, shape index: {}]   ;;  %s629_s5 = inlined_call_operand.vmem [shape: f32[1,32], index: 5, kind: input, shape index: {}]   ;;  %s630_s6 = inlined_call_operand.<no memory space> [shape: f32[1,1], index: 6, kind: input, shape index: {}]   ;;  %s631_s7 = inlined_call_operand.hbm [shape: f32[1,8], index: 7, kind: output, shape index: {}]  }
   0x1   :  { %v12_v0 = vstv %s630_s6 }
   0x2   :  { %13 = vst [vmem:[#allocation2] sm:$0x1] %v12_v0 }
   0x3   :  { %v29_v1 = vld [vmem:[%s624_s0] sm:$0xff]  ;;  %vm58_vm0 = vcmask 130048   ;;  %v31_v4 = vld [vmem:[%s625_s1 + $0x8] sm:$0xff]  ;;  %v499_v5 = vmov 0   ;;  %v36_v6 = vld [vmem:[%s626_s2 + $0x10] sm:$0xff] }
   0x4   :  { %v30_v2 = vld [vmem:[%s625_s1] sm:$0xff]  ;;  %421 = vmatprep.subr.msk.mxu0 %vm58_vm0, %v29_v1  ;;  %473 = vset.pattern.permute.xlu0 %v499_v5  ;;  %v32_v7 = vld [vmem:[%s625_s1 + $0x10] sm:$0xff]  ;;  %v35_v8 = vld [vmem:[%s626_s2 + $0x8] sm:$0xff] }
   0x5   :  { %423 = vmatprep.mubr.msk.f32.mxu0 %vm58_vm0, %v30_v2  ;;  %v34_v3 = vld [vmem:[%s626_s2] sm:$0xff]  ;;  %422 = vmatpush3.xpose.msk.msra.mxu0 %vm58_vm0, %v29_v1 }
   0x6   :  { %40 = vperm.xlu0 %473, %v34_v3   ;;  %474 = vset.pattern.permute.xlu1 %v499_v5 }
   0x7   :  { %50 = vperm.xlu1 %474, %v36_v6  }
   0x8   :  { %14 = vsyncpa [#allocation4], 0  ;;  %424 = vmatmul.mubr.msk.f32.vlgmr.msra.gmra.mrb[0].mxu0 %vm58_vm0, %v31_v4  ;;  %v37_v9 = vld [vmem:[%s626_s2 + $0x18] sm:$0xff]  ;;  %v167_v11 = vld [vmem:[%s628_s4] sm:$0xff]  ;;  %vm191_vm1 = vcmask 261120   ;;  %v500_v38 = vmov 0.0|0.0   ;;  %v300_v59 = vlaneseq }
   0x9   :  { %426 = vmatprep.mubr.msk.f32.mxu0 %vm58_vm0, %v32_v7  ;;  %v33_v10 = vld [vmem:[%s625_s1 + $0x18] sm:$0xff]  ;;  %v168_v12 = vld [vmem:[%s628_s4 + $0x8] sm:$0xff]  ;;  %v169_v13 = vld [vmem:[%s628_s4 + $0x10] sm:$0xff]  ;;  %462 = vmatprep.subr.bf16.mxu0 %v500_v38  ;;  %vm501_vm2 = vmmov 0   ;;  %v502_v39 = vmov 0.0   ;;  %s503_s9 = smov [#allocation3]  }
   0xa   :  { %45 = vperm.xlu0 %473, %v35_v8   ;;  %v170_v14 = vld [vmem:[%s628_s4 + $0x18] sm:$0xff]  ;;  %v294_v15 = vld [vmem:[#allocation2] sm:$0x1]  ;;  %v164_v35 = vld [vmem:[%s627_s3 + $0x8] sm:$0xff]  ;;  %v301_v60 = vshrl.u32 %v300_v59, 7  ;;  %s385_s0 = sshll.u32 %s503_s9, 4  ;;  %s386_s0 = int_to_ptr.vmem [resolvable:$true] %s385_s0 }
   0xb   :  { %55 = vperm.xlu1 %474, %v37_v9   ;;  %v163_v16 = vld [vmem:[%s627_s3] sm:$0xff]  ;;  %v165_v36 = vld [vmem:[%s627_s3 + $0x10] sm:$0xff]  ;;  %v166_v37 = vld [vmem:[%s627_s3 + $0x18] sm:$0xff]  ;;  %vm377_vm3 = vcmask 57344   ;;  %s475_s10 = scalar_lea.vmem %s386_s0, 16  ;;  %s479_s11 = scalar_lea.vmem %s386_s0, 32 }
   0xc   :  { %427 = vmatmul.mubr.msk.f32.gmra.mrb[2].mxu0 %vm58_vm0, %v33_v10  ;;  %437 = vmatprep.mubr.msk.f32.mxu1 %vm191_vm1, %v163_v16  ;;  %v293_v58 = vld [vmem:[%s629_s5] sm:$0x1]  ;;  %v302_v61 = vsub.s32 0, %v301_v60  ;;  %p476_p0 = scmp.ne.s32.totalorder %s386_s0, %s475_s10  ;;  %p480_p1 = scmp.lt.s32.totalorder %s386_s0, %s386_s0 }
   0xd   :  { %451 = vmatprep.mubr.msk.f32.mxu0 %vm501_vm2, %v502_v39  ;;  %p481_p2 = scmp.lt.s32.totalorder %s479_s11, %s475_s10 }
   0xe   :  { %173 = vperm.xlu0 %473, %v167_v11  }
   0xf   :  { %178 = vperm.xlu1 %474, %v168_v12   ;;  %p482_p3 = por %p481_p2, %p480_p1 }
  0x11   :  { %p483_p4 = pnand %p482_p3, %p476_p0 }
  0x12   :  { %183 = vperm.xlu0 %473, %v169_v13  }
  0x13   :  { %188 = vperm.xlu1 %474, %v170_v14  }
  0x16   :  { %297 = vperm.xlu0 %473, %v294_v15  }
  0x85   :  { %v41_v17 = vpop.permute.xlu0 %40 }
  0x86   :  { %v51_v18 = vpop.permute.xlu1 %50 }
  0x89   :  { %v46_v19 = vpop.permute.xlu0 %45 }
  0x8a   :  { %v56_v25 = vpop.permute.xlu1 %55 }
  0x8d   :  { %v174_v41 = vpop.permute.xlu0 %173 }
  0x8e   :  { %v179_v40 = vpop.permute.xlu1 %178 }
  0x91   :  { %v184_v50 = vpop.permute.xlu0 %183 }
  0x92   :  { %v189_v47 = vpop.permute.xlu1 %188 }
  0x95   :  { %v298_v62 = vpop.permute.xlu0 %297 }
  0x96   :  { %v303_v63 = vrot.slane %v298_v62, %v302_v61 }
  0xdb   :  { %v425_v20 = vpop.f32.mrb[0].mxu0 }
  0xdc   :  { %v146_v21 = vadd.f32 %v425_v20, %v46_v19  ;;  %v140_v22 = vpop.f32.mrb[1].mxu0 }
  0xdd   :  { %v141_v23 = vadd.f32 %v140_v22, %v41_v17 }
  0xde   :  { %v160_v24 = vmax.f32 %v146_v21, 0.0 }
  0xdf   :  { %v159_v26 = vmax.f32 %v141_v23, 0.0  ;;  %v428_v27 = vpop.f32.mrb[2].mxu0 }
  0xe0   :  { %v156_v28 = vadd.f32 %v428_v27, %v56_v25  ;;  %v150_v29 = vpop.f32.mrb[3].mxu0 }
  0xe1   :  { %v151_v30 = vadd.f32 %v150_v29, %v51_v18  ;;  %v454_v31 = vpack.c.bf16 %v160_v24, %v159_v26 }
  0xe2   :  { %v162_v32 = vmax.f32 %v156_v28, 0.0 }
  0xe3   :  { %v161_v33 = vmax.f32 %v151_v30, 0.0  ;;  %455 = vmatprep.subr.bf16.mxu1 %v454_v31 }
  0xe4   :  { %457 = vmatpush3.bf16.msra.mxu1 %v454_v31 }
  0xe5   :  { %v458_v34 = vpack.c.bf16 %v162_v32, %v161_v33 }
  0xe7   :  { %459 = vmatprep.subr.bf16.mxu1 %v458_v34 }
  0xe8   :  { %461 = vmatpush3.bf16.msra.mxu1 %v458_v34 }
  0xeb   :  { %438 = vmatmul.mubr.msk.f32.vlgmr.msra.gmra.mrb[0].mxu1 %vm191_vm1, %v164_v35 }
  0xec   :  { %440 = vmatprep.mubr.msk.f32.mxu1 %vm191_vm1, %v165_v36 }
  0xef   :  { %441 = vmatmul.mubr.msk.f32.gmra.mrb[2].mxu1 %vm191_vm1, %v166_v37 }
 0x1be   :  { %v439_v42 = vpop.f32.mrb[0].mxu1 }
 0x1bf   :  { %v276_v43 = vadd.f32 %v439_v42, %v179_v40  ;;  %v270_v44 = vpop.f32.mrb[1].mxu1 }
 0x1c0   :  { %v271_v45 = vadd.f32 %v270_v44, %v174_v41 }
 0x1c1   :  { %v290_v46 = vmax.f32 %v276_v43, 0.0 }
 0x1c2   :  { %v289_v48 = vmax.f32 %v271_v45, 0.0  ;;  %v442_v49 = vpop.f32.mrb[2].mxu1 }
 0x1c3   :  { %v286_v51 = vadd.f32 %v442_v49, %v189_v47  ;;  %v280_v52 = vpop.f32.mrb[3].mxu1 }
 0x1c4   :  { %v463_v53 = vpack.c.bf16 %v290_v46, %v289_v48  ;;  %v281_v54 = vadd.f32 %v280_v52, %v184_v50 }
 0x1c5   :  { %v292_v55 = vmax.f32 %v286_v51, 0.0 }
 0x1c6   :  { %v291_v56 = vmax.f32 %v281_v54, 0.0  ;;  %464 = vmatpush3.bf16.msra.mxu0 %v463_v53 }
 0x1c7   :  { %465 = vmatprep.subr.bf16.mxu0 %v500_v38 }
 0x1c8   :  { %v466_v57 = vpack.c.bf16 %v292_v55, %v291_v56 }
 0x1ca   :  { %467 = vmatpush3.bf16.msra.mxu0 %v466_v57 }
 0x1cd   :  { %452 = vmatmul.mubr.msk.f32.vlgmr.msra.gmra.mrb[4].mxu0 %vm191_vm1, %v293_v58 }
 0x2a0   :  { %v373_v0 = vpop.f32.mrb[4].mxu0 }
 0x2a1   :  { %v374_v1 = vadd.f32 %v373_v0, %v303_v63  ;;  %v453_v2 = vpop.f32.mrb[5].mxu0 }
 0x2a3   :  { %378 = vst.msk [vmem:[#allocation3] sm:$0x1] %vm377_vm3, %v374_v1 }
 0x2a4   :  { %486 = shalt.err (!%p483_p4)
}
 0x2a5   :  { %s487_s13 = scalar_lea.hbm %s631_s7, 16 }
 0x2a6   :  { %p488_p5 = scmp.ne.s32.totalorder %s631_s7, %s487_s13  ;;  %p491_p6 = scmp.lt.u32.totalorder %s487_s13, %s631_s7 }
 0x2a8   :  { %p493_p7 = pnand %p491_p6, %p488_p5 }
 0x2aa   :  { %496 = shalt.err (!%p493_p7)
}
 0x2ab   :  { %388 = dma.vmem_to_hbm [thread:$0]  %s386_s0, 16, %s631_s7, [#allocation4]  }
 0x2ac   :  { %497 = dma.done.wait [#allocation4], 16  }
 0x2ad   :  { %498 = vsyncadd [#allocation4], 4294967280 }
 0x2ae   :  { %392 = vsyncpa [#allocation4], 1 }

</bundles_post_ra>
